<compile_context>
chip_gen: v7x
topology: tpu7x:2x2x1
jax: 0.10.0
libtpu: 0.0.40
codegen_flags: <defaults>
</compile_context>

<pallas_src>
import functools

import jax
import jax.numpy as jnp
from jax.experimental import pallas as pl
from jax.experimental.pallas import tpu as pltpu  # noqa: F401  (TPU backend / memory spaces)

LANE = 128     # vreg lane width: every feature dim is zero-padded to this
SUBLANE = 8    # f32 sublane width: batch padded to a multiple of this


def _mlp_fused_kernel(x_ref, w_ref, b_ref, o_ref, *, n_layers):
    # x_ref: (Bp, 128) f32   w_ref: (L, 128, 128) f32   b_ref: (L, 1, 128) f32
    # o_ref: (Bp, 128) f32
    h = x_ref[...]
    for i in range(n_layers):  # static unroll; n_layers is compile-time
        # MXU matmul with f32 accumulation (default precision passed 1e-5 parity).
        h = jnp.dot(h, w_ref[i], preferred_element_type=jnp.float32)
        h = h + b_ref[i]                  # (1, 128) broadcast over batch rows
        if i < n_layers - 1:
            h = jnp.maximum(h, 0.0)       # ReLU; Dropout(0.5) = identity in eval mode
        else:
            h = jnp.tanh(h)               # final Tanh (EUP)
    o_ref[...] = h.astype(o_ref.dtype)


def init_mlp_params(key, input_size, hidden_sizes, output_size):
    """Deterministic params matching nn.Linear shapes (weights stored as (in, out))."""
    sizes = [input_size] + list(hidden_sizes) + [output_size]
    params = []
    for i in range(len(sizes) - 1):
        fan_in, fan_out = sizes[i], sizes[i + 1]
        key, kw, kb = jax.random.split(key, 3)
        bound = 1.0 / jnp.sqrt(fan_in)
        w = jax.random.uniform(kw, (fan_in, fan_out), jnp.float32, -bound, bound)
        b = jax.random.uniform(kb, (fan_out,), jnp.float32, -bound, bound)
        params.append((w, b))
    return params


def mlp_forward(params, x):
    """params: list of (w: (in, out), b: (out,)); x: (B, input_size). Returns (B, output_size)."""
    B, Din = x.shape
    n_layers = len(params)
    Dout = params[-1][1].shape[0]

    Bp = ((B + SUBLANE - 1) // SUBLANE) * SUBLANE

    # Zero-pad x to (Bp, 128); pad each W to (128, 128) and each b to (1, 128); stack slabs.
    xp = jnp.zeros((Bp, LANE), x.dtype).at[:B, :Din].set(x)
    w_stack = jnp.stack([
        jnp.zeros((LANE, LANE), jnp.float32).at[: w.shape[0], : w.shape[1]].set(w)
        for (w, _) in params
    ])
    b_stack = jnp.stack([
        jnp.zeros((1, LANE), jnp.float32).at[0, : b.shape[0]].set(b)
        for (_, b) in params
    ])

    flops = 2 * B * sum(int(w.shape[0]) * int(w.shape[1]) for (w, _) in params)
    bytes_accessed = 4 * (xp.size + w_stack.size + b_stack.size + Bp * LANE)

    kernel = functools.partial(_mlp_fused_kernel, n_layers=n_layers)

    out_p = pl.pallas_call(
        kernel,
        out_shape=jax.ShapeDtypeStruct((Bp, LANE), x.dtype),
        # Single grid point: full arrays resident in VMEM (everything fits trivially).
        in_specs=[
            pl.BlockSpec((Bp, LANE), lambda: (0, 0)),
            pl.BlockSpec((n_layers, LANE, LANE), lambda: (0, 0, 0)),
            pl.BlockSpec((n_layers, 1, LANE), lambda: (0, 0, 0)),
        ],
        out_specs=pl.BlockSpec((Bp, LANE), lambda: (0, 0)),
        cost_estimate=pl.CostEstimate(
            flops=flops,
            transcendentals=B * Dout,       # final tanh
            bytes_accessed=bytes_accessed,
        ),
    )(xp, w_stack, b_stack)

    return out_p[:B, :Dout]


if __name__ == "__main__":
    input_size = 32
    hidden_sizes = [64, 48]
    output_size = 16
    batch = 8

    key = jax.random.PRNGKey(0)
    key, kx = jax.random.split(key)
    x = jax.random.normal(kx, (batch, input_size), jnp.float32)

    params = init_mlp_params(key, input_size, hidden_sizes, output_size)

    out = mlp_forward(params, x)
    out = jax.block_until_ready(out)

    # Plain-JAX reference (eval-mode forward).
    h = x
    for i, (w, b) in enumerate(params):
        h = h @ w + b
        h = jnp.tanh(h) if i == len(params) - 1 else jnp.maximum(h, 0.0)
    assert out.shape == (batch, output_size)
    assert jnp.allclose(out, h, atol=1e-5, rtol=1e-5)

    print("KERNEL_OK")
</pallas_src>

<mosaic_0001>
module attributes {stable_mosaic.version = 11 : i64} {
  func.func @_mlp_fused_kernel(%arg0: memref<8x128xf32, #tpu.memory_space<vmem>>, %arg1: memref<3x128x128xf32, #tpu.memory_space<vmem>>, %arg2: memref<3x1x128xf32, #tpu.memory_space<vmem>>, %arg3: memref<8x128xf32, #tpu.memory_space<vmem>>) attributes {dimension_semantics = [], scalar_prefetch = 0 : i64, scratch_operands = 0 : i64, tpu.core_type = #tpu.core_type<tc>} {
    %c0 = arith.constant 0 : index
    %c0_0 = arith.constant 0 : index
    %0 = vector.load %arg0[%c0, %c0_0] : memref<8x128xf32, #tpu.memory_space<vmem>>, vector<8x128xf32>
    %c0_1 = arith.constant 0 : index
    %c0_2 = arith.constant 0 : index
    %c0_3 = arith.constant 0 : index
    %1 = vector.load %arg1[%c0_1, %c0_2, %c0_3] : memref<3x128x128xf32, #tpu.memory_space<vmem>>, vector<1x128x128xf32>
    %2 = vector.shape_cast %1 : vector<1x128x128xf32> to vector<128x128xf32>
    %cst = arith.constant dense<0.000000e+00> : vector<8x128xf32>
    %3 = tpu.matmul %0, %2, %cst {dimension_numbers = #tpu.dot_dimension_numbers<[1], [0], [0], [1], [0, 0, 1, 1], [], []>} : vector<8x128xf32>, vector<128x128xf32>, vector<8x128xf32> -> vector<8x128xf32>
    %c0_4 = arith.constant 0 : index
    %c0_5 = arith.constant 0 : index
    %c0_6 = arith.constant 0 : index
    %4 = vector.load %arg2[%c0_4, %c0_5, %c0_6] : memref<3x1x128xf32, #tpu.memory_space<vmem>>, vector<1x1x128xf32>
    %5 = vector.shape_cast %4 : vector<1x1x128xf32> to vector<1x128xf32>
    %6 = vector.broadcast %5 : vector<1x128xf32> to vector<8x128xf32>
    %7 = arith.addf %3, %6 : vector<8x128xf32>
    %cst_7 = arith.constant 0.000000e+00 : f32
    %8 = vector.broadcast %cst_7 : f32 to vector<8x128xf32>
    %9 = arith.maximumf %7, %8 : vector<8x128xf32>
    %c1 = arith.constant 1 : index
    %c0_8 = arith.constant 0 : index
    %c0_9 = arith.constant 0 : index
    %10 = vector.load %arg1[%c1, %c0_8, %c0_9] : memref<3x128x128xf32, #tpu.memory_space<vmem>>, vector<1x128x128xf32>
    %11 = vector.shape_cast %10 : vector<1x128x128xf32> to vector<128x128xf32>
    %cst_10 = arith.constant dense<0.000000e+00> : vector<8x128xf32>
    %12 = tpu.matmul %9, %11, %cst_10 {dimension_numbers = #tpu.dot_dimension_numbers<[1], [0], [0], [1], [0, 0, 1, 1], [], []>} : vector<8x128xf32>, vector<128x128xf32>, vector<8x128xf32> -> vector<8x128xf32>
    %c1_11 = arith.constant 1 : index
    %c0_12 = arith.constant 0 : index
    %c0_13 = arith.constant 0 : index
    %13 = vector.load %arg2[%c1_11, %c0_12, %c0_13] : memref<3x1x128xf32, #tpu.memory_space<vmem>>, vector<1x1x128xf32>
    %14 = vector.shape_cast %13 : vector<1x1x128xf32> to vector<1x128xf32>
    %15 = vector.broadcast %14 : vector<1x128xf32> to vector<8x128xf32>
    %16 = arith.addf %12, %15 : vector<8x128xf32>
    %cst_14 = arith.constant 0.000000e+00 : f32
    %17 = vector.broadcast %cst_14 : f32 to vector<8x128xf32>
    %18 = arith.maximumf %16, %17 : vector<8x128xf32>
    %c2 = arith.constant 2 : index
    %c0_15 = arith.constant 0 : index
    %c0_16 = arith.constant 0 : index
    %19 = vector.load %arg1[%c2, %c0_15, %c0_16] : memref<3x128x128xf32, #tpu.memory_space<vmem>>, vector<1x128x128xf32>
    %20 = vector.shape_cast %19 : vector<1x128x128xf32> to vector<128x128xf32>
    %cst_17 = arith.constant dense<0.000000e+00> : vector<8x128xf32>
    %21 = tpu.matmul %18, %20, %cst_17 {dimension_numbers = #tpu.dot_dimension_numbers<[1], [0], [0], [1], [0, 0, 1, 1], [], []>} : vector<8x128xf32>, vector<128x128xf32>, vector<8x128xf32> -> vector<8x128xf32>
    %c2_18 = arith.constant 2 : index
    %c0_19 = arith.constant 0 : index
    %c0_20 = arith.constant 0 : index
    %22 = vector.load %arg2[%c2_18, %c0_19, %c0_20] : memref<3x1x128xf32, #tpu.memory_space<vmem>>, vector<1x1x128xf32>
    %23 = vector.shape_cast %22 : vector<1x1x128xf32> to vector<1x128xf32>
    %24 = vector.broadcast %23 : vector<1x128xf32> to vector<8x128xf32>
    %25 = arith.addf %21, %24 : vector<8x128xf32>
    %26 = math.tanh %25 : vector<8x128xf32>
    %c0_21 = arith.constant 0 : index
    %c0_22 = arith.constant 0 : index
    %27 = vector.load %arg3[%c0_21, %c0_22] : memref<8x128xf32, #tpu.memory_space<vmem>>, vector<8x128xf32>
    tpu.vector_store %arg3[%c0_21, %c0_22], %26 {strides = array<i32>} : memref<8x128xf32, #tpu.memory_space<vmem>>, vector<8x128xf32>,
    return
  }
}

</mosaic_0001>

<bundles_post_ra>
// kernel: tpu_custom_call.1
= control target key start
LH: loop header
LB: loop body
LE: loop exit
PB: predicated region body
PF: predicated region fallthrough
CT: control target
= control target key end

     0   :  { %8 = vsyncpa [#allocation3], 0  ;;  %s770_s0 = inlined_call_operand.hbm [shape: f32[8,128], index: 0, kind: input, shape index: {}]   ;;  %s771_s1 = inlined_call_operand.hbm [shape: f32[3,128,128], index: 1, kind: input, shape index: {}]   ;;  %s772_s2 = inlined_call_operand.vmem [shape: f32[3,1,128], index: 2, kind: input, shape index: {}]   ;;  %s773_s3 = inlined_call_operand.hbm [shape: f32[8,128], index: 3, kind: output, shape index: {}]  }
   0x1   :  { %9 = vsyncpa [#allocation6], 0 }
   0x2   :  { %10 = vsyncpa [#allocation4], 0  ;;  %s660_s12 = smov [#allocation2]   ;;  %s661_s14 = smov [#allocation5]  }
   0x3   :  { %s17_s13 = sshll.u32 %s660_s12, 4  ;;  %s26_s15 = sshll.u32 %s661_s14, 4  ;;  %s18_s13 = int_to_ptr.vmem [resolvable:$true] %s17_s13  ;;  %s688_s15 = int_to_ptr.vmem [resolvable:$true] %s26_s15 }
   0x4   :  { %s588_s18 = scalar_lea.hbm %s770_s0, 128 }
   0x5   :  { %p589_p0 = scmp.ne.s32.totalorder %s770_s0, %s588_s18  ;;  %p592_p1 = scmp.lt.u32.totalorder %s588_s18, %s770_s0 }
   0x7   :  { %p594_p2 = pnand %p592_p1, %p589_p0 }
   0x9   :  { %597 = shalt.err (!%p594_p2)
}
   0xa   :  { %s598_s23 = scalar_lea.vmem %s18_s13, 128  ;;  %p603_p4 = scmp.lt.s32.totalorder %s18_s13, %s18_s13 }
   0xb   :  { %p599_p3 = scmp.ne.s32.totalorder %s18_s13, %s598_s23  ;;  %p604_p5 = scmp.lt.s32.totalorder %s598_s23, %s598_s23 }
   0xd   :  { %p605_p6 = por %p604_p5, %p603_p4 }
   0xf   :  { %p606_p7 = pnand %p605_p6, %p599_p3 }
  0x11   :  { %609 = shalt.err (!%p606_p7)
}
  0x12   :  { %20 = dma.hbm_to_vmem [thread:$0]  %s770_s0, 128, %s18_s13, [#allocation3]  }
  0x13   :  { %s610_s28 = scalar_lea.hbm %s771_s1, 6144 }
  0x14   :  { %p611_p8 = scmp.ne.s32.totalorder %s771_s1, %s610_s28  ;;  %p614_p9 = scmp.lt.u32.totalorder %s610_s28, %s771_s1 }
  0x16   :  { %p616_p10 = pnand %p614_p9, %p611_p8 }
  0x18   :  { %619 = shalt.err (!%p616_p10)
}
  0x19   :  { %s620_s6 = scalar_lea.vmem %s688_s15, 6144  ;;  %p625_p12 = scmp.lt.s32.totalorder %s688_s15, %s688_s15 }
  0x1a   :  { %p621_p11 = scmp.ne.s32.totalorder %s688_s15, %s620_s6  ;;  %p626_p13 = scmp.lt.s32.totalorder %s620_s6, %s620_s6 }
  0x1c   :  { %p627_p0 = por %p626_p13, %p625_p12 }
  0x1e   :  { %p628_p1 = pnand %p627_p0, %p621_p11 }
  0x20   :  { %631 = shalt.err (!%p628_p1)
}
  0x21   :  { %s662_s0 = smov 128   ;;  %s663_s7 = smov 8  }
  0x22   :  { %32 = dma.hbm_to_vmem [thread:$0]  %s771_s1, 6144, %s688_s15, [#allocation6], %s662_s0, %s662_s0, %s663_s7  }
  0x23   :  { %654 = dma.done.wait [#allocation3], 128  }
  0x24   :  { %655 = vsyncadd [#allocation3], 4294967168 }
  0x25   :  { %656 = dma.done.wait [#allocation6], 6144  }
  0x26   :  { %657 = vsyncadd [#allocation6], 4294961152  ;;  %v664_v0 = vmov 0.0|0.0   ;;  %vm665_vm0 = vmmov 0   ;;  %v666_v1 = vmov 0.0   ;;  %v42_v2 = vld [vmem:[#allocation5] sm:$0xff] }
  0x27   :  { %506 = vmatprep.subr.bf16.mxu0 %v664_v0  ;;  %433 = vmatprep.mubr.msk.f32.mxu0 %vm665_vm0, %v666_v1  ;;  %v43_v3 = vld [vmem:[#allocation5 + $0x8] sm:$0xff]  ;;  %v44_v4 = vld [vmem:[#allocation5 + $0x10] sm:$0xff]  ;;  %v45_v6 = vld [vmem:[#allocation5 + $0x18] sm:$0xff]  ;;  %s667_s15 = smov [#allocation7]  }
  0x28   :  { %530 = vmatprep.subr.bf16.mxu1 %v664_v0  ;;  %468 = vmatprep.mubr.msk.f32.mxu1 %vm665_vm0, %v666_v1  ;;  %v507_v5 = vpack.c.bf16 %v43_v3, %v42_v2  ;;  %v510_v7 = vpack.c.bf16 %v45_v6, %v44_v4  ;;  %v46_v8 = vld [vmem:[#allocation5 + $0x20] sm:$0xff]  ;;  %v47_v9 = vld [vmem:[#allocation5 + $0x28] sm:$0xff]  ;;  %v139_v12 = vld [vmem:[#allocation5 + $0x90] sm:$0xff]  ;;  %s335_s16 = sshll.u32 %s667_s15, 4  ;;  %s336_s16 = int_to_ptr.vmem [resolvable:$true] %s335_s16 }
  0x29   :  { %v137_v10 = vld [vmem:[#allocation5 + $0x80] sm:$0xff]  ;;  %v138_v11 = vld [vmem:[#allocation5 + $0x88] sm:$0xff]  ;;  %v140_v13 = vld [vmem:[#allocation5 + $0x98] sm:$0xff]  ;;  %v513_v14 = vpack.c.bf16 %v47_v9, %v46_v8  ;;  %s632_s17 = scalar_lea.vmem %s336_s16, 128  ;;  %p637_p3 = scmp.lt.s32.totalorder %s336_s16, %s336_s16 }
  0x2a   :  { %508 = vmatpush3.bf16.msra.mxu0 %v507_v5  ;;  %v531_v15 = vpack.c.bf16 %v138_v11, %v137_v10  ;;  %v48_v16 = vld [vmem:[#allocation5 + $0x30] sm:$0xff]  ;;  %v49_v17 = vld [vmem:[#allocation5 + $0x38] sm:$0xff]  ;;  %v534_v18 = vpack.c.bf16 %v140_v13, %v139_v12  ;;  %v141_v19 = vld [vmem:[#allocation5 + $0xa0] sm:$0xff]  ;;  %p633_p2 = scmp.ne.s32.totalorder %s336_s16, %s632_s17  ;;  %p638_p4 = scmp.lt.s32.totalorder %s632_s17, %s632_s17 }
  0x2b   :  { %509 = vmatprep.subr.bf16.mxu0 %v664_v0  ;;  %v142_v20 = vld [vmem:[#allocation5 + $0xa8] sm:$0xff]  ;;  %v516_v21 = vpack.c.bf16 %v49_v17, %v48_v16  ;;  %v50_v22 = vld [vmem:[#allocation5 + $0x40] sm:$0xff]  ;;  %v143_v25 = vld [vmem:[#allocation5 + $0xb0] sm:$0xff] }
  0x2c   :  { %532 = vmatpush3.bf16.msra.mxu1 %v531_v15  ;;  %v51_v23 = vld [vmem:[#allocation5 + $0x48] sm:$0xff]  ;;  %v537_v24 = vpack.c.bf16 %v142_v20, %v141_v19  ;;  %v144_v26 = vld [vmem:[#allocation5 + $0xb8] sm:$0xff]  ;;  %v52_v28 = vld [vmem:[#allocation5 + $0x50] sm:$0xff]  ;;  %p639_p5 = por %p638_p4, %p637_p3 }
  0x2d   :  { %533 = vmatprep.subr.bf16.mxu1 %v664_v0  ;;  %v519_v27 = vpack.c.bf16 %v51_v23, %v50_v22  ;;  %v53_v29 = vld [vmem:[#allocation5 + $0x58] sm:$0xff]  ;;  %v540_v30 = vpack.c.bf16 %v144_v26, %v143_v25  ;;  %v145_v31 = vld [vmem:[#allocation5 + $0xc0] sm:$0xff]  ;;  %v146_v32 = vld [vmem:[#allocation5 + $0xc8] sm:$0xff] }
  0x2e   :  { %511 = vmatpush3.bf16.msra.mxu0 %v510_v7  ;;  %v522_v33 = vpack.c.bf16 %v53_v29, %v52_v28  ;;  %v54_v34 = vld [vmem:[#allocation5 + $0x60] sm:$0xff]  ;;  %v55_v35 = vld [vmem:[#allocation5 + $0x68] sm:$0xff]  ;;  %v543_v36 = vpack.c.bf16 %v146_v32, %v145_v31  ;;  %v147_v37 = vld [vmem:[#allocation5 + $0xd0] sm:$0xff]  ;;  %p640_p6 = pnand %p639_p5, %p633_p2 }
  0x2f   :  { %512 = vmatprep.subr.bf16.mxu0 %v664_v0  ;;  %v148_v38 = vld [vmem:[#allocation5 + $0xd8] sm:$0xff]  ;;  %v525_v39 = vpack.c.bf16 %v55_v35, %v54_v34  ;;  %v56_v40 = vld [vmem:[#allocation5 + $0x70] sm:$0xff]  ;;  %v149_v43 = vld [vmem:[#allocation5 + $0xe0] sm:$0xff] }
  0x30   :  { %535 = vmatpush3.bf16.msra.mxu1 %v534_v18  ;;  %v57_v41 = vld [vmem:[#allocation5 + $0x78] sm:$0xff]  ;;  %v546_v42 = vpack.c.bf16 %v148_v38, %v147_v37  ;;  %v150_v44 = vld [vmem:[#allocation5 + $0xe8] sm:$0xff]  ;;  %v151_v48 = vld [vmem:[#allocation5 + $0xf0] sm:$0xff] }
  0x31   :  { %536 = vmatprep.subr.bf16.mxu1 %v664_v0  ;;  %v528_v45 = vpack.c.bf16 %v57_v41, %v56_v40  ;;  %v549_v46 = vpack.c.bf16 %v150_v44, %v149_v43  ;;  %v41_v47 = vld [vmem:[#allocation2] sm:$0xff]  ;;  %v233_v51 = vld [vmem:[#allocation5 + $0x100] sm:$0xff]  ;;  %v234_v52 = vld [vmem:[#allocation5 + $0x108] sm:$0xff] }
  0x32   :  { %514 = vmatpush3.bf16.msra.mxu0 %v513_v14  ;;  %v152_v49 = vld [vmem:[#allocation5 + $0xf8] sm:$0xff]  ;;  %v235_v53 = vld [vmem:[#allocation5 + $0x110] sm:$0xff]  ;;  %v555_v54 = vpack.c.bf16 %v234_v52, %v233_v51  ;;  %v237_v57 = vld [vmem:[#allocation5 + $0x120] sm:$0xff] }
  0x33   :  { %515 = vmatprep.subr.bf16.mxu0 %v664_v0  ;;  %v552_v50 = vpack.c.bf16 %v152_v49, %v151_v48  ;;  %v236_v55 = vld [vmem:[#allocation5 + $0x118] sm:$0xff]  ;;  %v238_v58 = vld [vmem:[#allocation5 + $0x128] sm:$0xff]  ;;  %v239_v60 = vld [vmem:[#allocation5 + $0x130] sm:$0xff] }
  0x34   :  { %538 = vmatpush3.bf16.msra.mxu1 %v537_v24  ;;  %v558_v56 = vpack.c.bf16 %v236_v55, %v235_v53  ;;  %v561_v59 = vpack.c.bf16 %v238_v58, %v237_v57  ;;  %v240_v61 = vld [vmem:[#allocation5 + $0x138] sm:$0xff]  ;;  %v241_v63 = vld [vmem:[#allocation5 + $0x140] sm:$0xff]  ;;  %v243_v3 = vld [vmem:[#allocation5 + $0x150] sm:$0xff] }
  0x35   :  { %539 = vmatprep.subr.bf16.mxu1 %v664_v0  ;;  %v564_v62 = vpack.c.bf16 %v240_v61, %v239_v60  ;;  %v244_v4 = vld [vmem:[#allocation5 + $0x158] sm:$0xff]  ;;  %v245_v6 = vld [vmem:[#allocation5 + $0x160] sm:$0xff]  ;;  %v246_v7 = vld [vmem:[#allocation5 + $0x168] sm:$0xff] }
  0x36   :  { %517 = vmatpush3.bf16.msra.mxu0 %v516_v21  ;;  %v570_v5 = vpack.c.bf16 %v244_v4, %v243_v3  ;;  %v573_v8 = vpack.c.bf16 %v246_v7, %v245_v6  ;;  %v345_v9 = vld [vmem:[%s772_s2] ss:$0 sm:$0xff]  ;;  %v247_v14 = vld [vmem:[#allocation5 + $0x170] sm:$0xff]  ;;  %v347_v17 = vld [vmem:[%s772_s2 + $0x1] ss:$0 sm:$0xff] }
  0x37   :  { %518 = vmatprep.subr.bf16.mxu0 %v664_v0  ;;  %v248_v15 = vld [vmem:[#allocation5 + $0x178] sm:$0xff] }
  0x38   :  { %541 = vmatpush3.bf16.msra.mxu1 %v540_v30  ;;  %v576_v16 = vpack.c.bf16 %v248_v15, %v247_v14  ;;  %v349_v21 = vld [vmem:[%s772_s2 + $0x2] ss:$0 sm:$0xff] }
  0x39   :  { %542 = vmatprep.subr.bf16.mxu1 %v664_v0 }
  0x3a   :  { %520 = vmatpush3.bf16.msra.mxu0 %v519_v27 }
  0x3b   :  { %521 = vmatprep.subr.bf16.mxu0 %v664_v0 }
  0x3c   :  { %544 = vmatpush3.bf16.msra.mxu1 %v543_v36 }
  0x3d   :  { %545 = vmatprep.subr.bf16.mxu1 %v664_v0 }
  0x3e   :  { %523 = vmatpush3.bf16.msra.mxu0 %v522_v33 }
  0x3f   :  { %524 = vmatprep.subr.bf16.mxu0 %v664_v0 }
  0x40   :  { %547 = vmatpush3.bf16.msra.mxu1 %v546_v42 }
  0x41   :  { %548 = vmatprep.subr.bf16.mxu1 %v664_v0 }
  0x42   :  { %526 = vmatpush3.bf16.msra.mxu0 %v525_v39 }
  0x43   :  { %527 = vmatprep.subr.bf16.mxu0 %v664_v0 }
  0x44   :  { %550 = vmatpush3.bf16.msra.mxu1 %v549_v46 }
  0x45   :  { %551 = vmatprep.subr.bf16.mxu1 %v664_v0 }
  0x46   :  { %529 = vmatpush3.bf16.msra.mxu0 %v528_v45 }
  0x47   :  { %554 = vmatprep.subr.bf16.mxu0 %v664_v0 }
  0x48   :  { %553 = vmatpush3.bf16.msra.mxu1 %v552_v50 }
  0x49   :  { %434 = vmatmul.mubr.f32.vlgmr.msra.gmra.mrb[0].mxu0 %v41_v47 }
  0x4a   :  { %503 = vmatprep.mubr.msk.f32.mxu0 %vm665_vm0, %v666_v1  ;;  %556 = vmatpush3.bf16.msra.mxu0 %v555_v54  ;;  %v242_v1 = vld [vmem:[#allocation5 + $0x148] sm:$0xff] }
  0x4b   :  { %557 = vmatprep.subr.bf16.mxu0 %v664_v0  ;;  %v567_v2 = vpack.c.bf16 %v242_v1, %v241_v63 }
  0x4e   :  { %559 = vmatpush3.bf16.msra.mxu0 %v558_v56 }
  0x4f   :  { %560 = vmatprep.subr.bf16.mxu0 %v664_v0 }
  0x52   :  { %562 = vmatpush3.bf16.msra.mxu0 %v561_v59 }
  0x53   :  { %563 = vmatprep.subr.bf16.mxu0 %v664_v0 }
  0x56   :  { %565 = vmatpush3.bf16.msra.mxu0 %v564_v62 }
  0x57   :  { %566 = vmatprep.subr.bf16.mxu0 %v664_v0 }
  0x5a   :  { %568 = vmatpush3.bf16.msra.mxu0 %v567_v2 }
  0x5b   :  { %569 = vmatprep.subr.bf16.mxu0 %v664_v0 }
  0x5e   :  { %571 = vmatpush3.bf16.msra.mxu0 %v570_v5 }
  0x5f   :  { %572 = vmatprep.subr.bf16.mxu0 %v664_v0 }
  0x62   :  { %574 = vmatpush3.bf16.msra.mxu0 %v573_v8 }
  0x63   :  { %575 = vmatprep.subr.bf16.mxu0 %v664_v0 }
  0x66   :  { %577 = vmatpush3.bf16.msra.mxu0 %v576_v16 }
 0x11c   :  { %v131_v10 = vpop.f32.mrb[0].mxu0 }
 0x11d   :  { %v132_v11 = vadd.f32 %v345_v9, %v131_v10  ;;  %v435_v12 = vpop.f32.mrb[1].mxu0 }
 0x11f   :  { %v135_v13 = vmax.f32 %v132_v11, 0.0 }
 0x121   :  { %469 = vmatmul.mubr.f32.vlgmr.msra.gmra.mrb[0].mxu1 %v135_v13 }
 0x1f4   :  { %v227_v18 = vpop.f32.mrb[0].mxu1 }
 0x1f5   :  { %v228_v19 = vadd.f32 %v347_v17, %v227_v18  ;;  %v470_v0 = vpop.f32.mrb[1].mxu1 }
 0x1f7   :  { %v231_v20 = vmax.f32 %v228_v19, 0.0 }
 0x1f9   :  { %504 = vmatmul.mubr.f32.vlgmr.msra.gmra.mrb[2].mxu0 %v231_v20 }
 0x2cc   :  { %v323_v22 = vpop.f32.mrb[2].mxu0 }
 0x2cd   :  { %v324_v23 = vadd.f32 %v349_v21, %v323_v22  ;;  %v505_v24 = vpop.f32.mrb[3].mxu0 }
 0x2cf   :  { %586 = vtanh.f32 %v324_v23 }
 0x2d9   :  { %v587_v25 = vpop.eup %586 }
 0x2da   :  { %328 = vst [vmem:[#allocation7] sm:$0xff] %v587_v25 }
 0x2db   :  { %643 = shalt.err (!%p640_p6)
}
 0x2dc   :  { %s644_s2 = scalar_lea.hbm %s773_s3, 128 }
 0x2dd   :  { %p645_p7 = scmp.ne.s32.totalorder %s773_s3, %s644_s2  ;;  %p648_p8 = scmp.lt.u32.totalorder %s644_s2, %s773_s3 }
 0x2df   :  { %p650_p9 = pnand %p648_p8, %p645_p7 }
 0x2e1   :  { %653 = shalt.err (!%p650_p9)
}
 0x2e2   :  { %338 = dma.vmem_to_hbm [thread:$0]  %s336_s16, 128, %s773_s3, [#allocation4]  }
 0x2e3   :  { %658 = dma.done.wait [#allocation4], 128  }
 0x2e4   :  { %659 = vsyncadd [#allocation4], 4294967168 }
 0x2e5   :  { %342 = vsyncpa [#allocation3], 1 }
 0x2e6   :  { %343 = vsyncpa [#allocation6], 1 }
 0x2e7   :  { %344 = vsyncpa [#allocation4], 1 }

</bundles_post_ra>
